<compile_context>
chip_gen: v5e
topology: v5e:2x2
jax: 0.10.0
libtpu: 0.0.40
codegen_flags: <defaults>
</compile_context>

<pallas_src>
import functools

import jax
import jax.numpy as jnp
from jax.experimental import pallas as pl
from jax.experimental.pallas import tpu as pltpu

LANE = 128
SUBLANE = 8


def _bce_blur_kernel(pred_ref, true_ref, out_ref, *, alpha, n, block_rows):
    i = pl.program_id(0)

    x = pred_ref[...].astype(jnp.float32)
    y = true_ref[...].astype(jnp.float32)

    # In-kernel validity mask: flat element index < n.
    row = jax.lax.broadcasted_iota(jnp.int32, (block_rows, LANE), 0)
    lane = jax.lax.broadcasted_iota(jnp.int32, (block_rows, LANE), 1)
    flat_idx = (i * block_rows + row) * LANE + lane
    valid = flat_idx < n

    # Numerically-stable BCE with logits (matches torch.nn.BCEWithLogitsLoss):
    #   loss = max(x, 0) - x*y + log(1 + exp(-|x|))
    # Reuse e = exp(-|x|) for both the log1p term and the stable sigmoid.
    e = jnp.exp(-jnp.abs(x))
    loss = jnp.maximum(x, 0.0) - x * y + jnp.log1p(e)

    r = 1.0 / (1.0 + e)
    p = jnp.where(x >= 0.0, r, e * r)        # sigmoid(pred), stable both sides
    dx = p - y
    alpha_factor = 1.0 - jnp.exp((dx - 1.0) / (alpha + 1e-4))

    val = jnp.where(valid, loss * alpha_factor, 0.0)

    # Fold (block_rows, 128) -> (8, 128) with cheap vreg adds (VPU only);
    # the expensive cross-lane reduction happens once, outside the kernel.
    folded = val.reshape(block_rows // SUBLANE, SUBLANE, LANE).sum(axis=0)
    out_ref[0] = folded


def bce_blur_with_logits_loss(pred, true, alpha=0.05, block_rows=512):
    """Returns a scalar float32 loss, same semantics as the PyTorch module."""
    assert pred.shape == true.shape
    n = int(pred.size)
    assert n > 0

    # Round the requested tile height to a sublane multiple, then shrink it to
    # the actual problem size so small inputs don't get padded to huge tiles.
    block_rows = max(SUBLANE, (block_rows // SUBLANE) * SUBLANE)
    rows_raw = -(-n // LANE)                             # ceil(n / 128)
    rows_min = max(SUBLANE, -(-rows_raw // SUBLANE) * SUBLANE)
    block_rows_eff = min(block_rows, rows_min)

    grid_size = -(-rows_raw // block_rows_eff)
    rows = grid_size * block_rows_eff
    padded = rows * LANE

    pred_flat = pred.reshape(-1)
    true_flat = true.reshape(-1)
    if padded != n:
        # Pad only when necessary, and in the *original* dtype (no f32 upcast
        # pass on the host side).
        pred_flat = jnp.pad(pred_flat, (0, padded - n))
        true_flat = jnp.pad(true_flat, (0, padded - n))
    pred2 = pred_flat.reshape(rows, LANE)
    true2 = true_flat.reshape(rows, LANE)

    kernel = functools.partial(
        _bce_blur_kernel, alpha=float(alpha), n=n, block_rows=block_rows_eff)

    tile_spec = pl.BlockSpec((block_rows_eff, LANE), lambda i: (i, 0))

    partials = pl.pallas_call(
        kernel,
        out_shape=jax.ShapeDtypeStruct((grid_size, SUBLANE, LANE), jnp.float32),
        grid_spec=pltpu.PrefetchScalarGridSpec(
            num_scalar_prefetch=0,
            grid=(grid_size,),
            in_specs=[tile_spec, tile_spec],
            out_specs=pl.BlockSpec((1, SUBLANE, LANE), lambda i: (i, 0, 0)),
        ),
        compiler_params=pltpu.CompilerParams(
            dimension_semantics=("parallel",)),
    )(pred2, true2)

    return jnp.sum(partials) / jnp.float32(n)


def _reference(pred, true, alpha=0.05):
    x = pred.astype(jnp.float32)
    y = true.astype(jnp.float32)
    loss = jnp.maximum(x, 0.0) - x * y + jnp.log1p(jnp.exp(-jnp.abs(x)))
    p = jax.nn.sigmoid(x)
    dx = p - y
    alpha_factor = 1.0 - jnp.exp((dx - 1.0) / (alpha + 1e-4))
    return jnp.mean(loss * alpha_factor)


if __name__ == "__main__":
    key = jax.random.PRNGKey(0)
    k1, k2 = jax.random.split(key)

    # Small NCHW-shaped logits / targets, like a YOLO objectness head slice.
    shape = (2, 4, 16, 16)
    pred = jax.random.normal(k1, shape, dtype=jnp.float32)
    true = (jax.random.uniform(k2, shape) > 0.7).astype(jnp.float32)

    loss = bce_blur_with_logits_loss(pred, true, alpha=0.05)
    loss = jax.block_until_ready(loss)

    ref = _reference(pred, true, alpha=0.05)
    assert jnp.allclose(loss, ref, rtol=1e-5, atol=1e-6), (loss, ref)

    print("KERNEL_OK")
</pallas_src>

<mosaic_0001>
module attributes {stable_mosaic.version = 11 : i64} {
  func.func @_bce_blur_kernel(%arg0: i32, %arg1: memref<16x128xf32, #tpu.memory_space<vmem>>, %arg2: memref<16x128xf32, #tpu.memory_space<vmem>>, %arg3: memref<1x8x128xf32, #tpu.memory_space<vmem>>) attributes {dimension_semantics = [#tpu.dimension_semantics<parallel>], iteration_bounds = array<i64: 1>, scalar_prefetch = 0 : i64, scratch_operands = 0 : i64, tpu.core_type = #tpu.core_type<tc>, window_params = [{transform_indices = @transform_0, window_bounds = array<i64: 16, 128>}, {transform_indices = @transform_1, window_bounds = array<i64: 16, 128>}, {transform_indices = @transform_2, window_bounds = array<i64: 1, 8, 128>}]} {
    %c0 = arith.constant 0 : index
    %c0_0 = arith.constant 0 : index
    %0 = vector.load %arg1[%c0, %c0_0] : memref<16x128xf32, #tpu.memory_space<vmem>>, vector<16x128xf32>
    %c0_1 = arith.constant 0 : index
    %c0_2 = arith.constant 0 : index
    %1 = vector.load %arg2[%c0_1, %c0_2] : memref<16x128xf32, #tpu.memory_space<vmem>>, vector<16x128xf32>
    %2 = tpu.iota {dimensions = array<i32: 0>} : vector<16x128xi32>
    %3 = tpu.iota {dimensions = array<i32: 1>} : vector<16x128xi32>
    %c16_i32 = arith.constant 16 : i32
    %4 = arith.muli %arg0, %c16_i32 : i32
    %5 = vector.broadcast %4 : i32 to vector<16x128xi32>
    %6 = arith.addi %5, %2 : vector<16x128xi32>
    %c128_i32 = arith.constant 128 : i32
    %7 = vector.broadcast %c128_i32 : i32 to vector<16x128xi32>
    %8 = arith.muli %6, %7 : vector<16x128xi32>
    %9 = arith.addi %8, %3 : vector<16x128xi32>
    %c2048_i32 = arith.constant 2048 : i32
    %10 = vector.broadcast %c2048_i32 : i32 to vector<16x128xi32>
    %11 = arith.cmpi slt, %9, %10 : vector<16x128xi32>
    %12 = math.absf %0 : vector<16x128xf32>
    %cst = arith.constant 0.000000e+00 : f32
    %13 = vector.broadcast %cst : f32 to vector<16x128xf32>
    %14 = arith.subf %13, %12 : vector<16x128xf32>
    %15 = math.exp %14 : vector<16x128xf32>
    %cst_3 = arith.constant 0.000000e+00 : f32
    %16 = vector.broadcast %cst_3 : f32 to vector<16x128xf32>
    %17 = arith.maximumf %0, %16 : vector<16x128xf32>
    %18 = arith.mulf %0, %1 : vector<16x128xf32>
    %19 = arith.subf %17, %18 : vector<16x128xf32>
    %20 = math.log1p %15 : vector<16x128xf32>
    %21 = arith.addf %19, %20 : vector<16x128xf32>
    %cst_4 = arith.constant 1.000000e+00 : f32
    %22 = vector.broadcast %cst_4 : f32 to vector<16x128xf32>
    %23 = arith.addf %22, %15 : vector<16x128xf32>
    %cst_5 = arith.constant 1.000000e+00 : f32
    %24 = vector.broadcast %cst_5 : f32 to vector<16x128xf32>
    %25 = arith.divf %24, %23 : vector<16x128xf32>
    %cst_6 = arith.constant 0.000000e+00 : f32
    %26 = vector.broadcast %cst_6 : f32 to vector<16x128xf32>
    %27 = arith.cmpf oge, %0, %26 : vector<16x128xf32>
    %28 = arith.mulf %15, %25 : vector<16x128xf32>
    %29 = arith.select %27, %25, %28 : vector<16x128xi1>, vector<16x128xf32>
    %30 = arith.subf %29, %1 : vector<16x128xf32>
    %cst_7 = arith.constant 1.000000e+00 : f32
    %31 = vector.broadcast %cst_7 : f32 to vector<16x128xf32>
    %32 = arith.subf %30, %31 : vector<16x128xf32>
    %cst_8 = arith.constant 5.010000e-02 : f32
    %33 = vector.broadcast %cst_8 : f32 to vector<16x128xf32>
    %34 = arith.divf %32, %33 : vector<16x128xf32>
    %35 = math.exp %34 : vector<16x128xf32>
    %cst_9 = arith.constant 1.000000e+00 : f32
    %36 = vector.broadcast %cst_9 : f32 to vector<16x128xf32>
    %37 = arith.subf %36, %35 : vector<16x128xf32>
    %38 = arith.mulf %21, %37 : vector<16x128xf32>
    %cst_10 = arith.constant 0.000000e+00 : f32
    %39 = vector.broadcast %cst_10 : f32 to vector<16x128xf32>
    %40 = arith.select %11, %38, %39 : vector<16x128xi1>, vector<16x128xf32>
    %41 = vector.shape_cast %40 : vector<16x128xf32> to vector<2x8x128xf32>
    %cst_11 = arith.constant dense<0.000000e+00> : vector<8x128xf32>
    %42 = vector.multi_reduction <add>, %41, %cst_11 [0] : vector<2x8x128xf32> to vector<8x128xf32>
    %c0_12 = arith.constant 0 : index
    %c0_13 = arith.constant 0 : index
    %c0_14 = arith.constant 0 : index
    %43 = vector.load %arg3[%c0_12, %c0_13, %c0_14] : memref<1x8x128xf32, #tpu.memory_space<vmem>>, vector<1x8x128xf32>
    %44 = vector.shape_cast %43 : vector<1x8x128xf32> to vector<8x128xf32>
    %45 = vector.shape_cast %42 : vector<8x128xf32> to vector<1x8x128xf32>
    tpu.vector_store %arg3[%c0_12, %c0_13, %c0_14], %45 {strides = array<i32>} : memref<1x8x128xf32, #tpu.memory_space<vmem>>, vector<1x8x128xf32>,
    return
  }
  func.func @transform_0(%arg0: i32) -> (i32, i32) {
    %c0_i32 = arith.constant 0 : i32
    %c0_i32_0 = arith.constant 0 : i32
    return %arg0, %c0_i32 : i32, i32
  }
  func.func @transform_1(%arg0: i32) -> (i32, i32) {
    %c0_i32 = arith.constant 0 : i32
    %c0_i32_0 = arith.constant 0 : i32
    return %arg0, %c0_i32 : i32, i32
  }
  func.func @transform_2(%arg0: i32) -> (i32, i32, i32) {
    %c0_i32 = arith.constant 0 : i32
    %c0_i32_0 = arith.constant 0 : i32
    %c0_i32_1 = arith.constant 0 : i32
    return %arg0, %c0_i32, %c0_i32_0 : i32, i32, i32
  }
}

</mosaic_0001>

<bundles_post_ra>
// kernel: tpu_custom_call.1
= control target key start
LH: loop header
LB: loop body
LE: loop exit
PB: predicated region body
PF: predicated region fallthrough
CT: control target
= control target key end

     0   :  { %7 = vsyncpa [#allocation3], 0  ;;  %s344_s0 = inlined_call_operand.hbm [shape: f32[16,128], index: 0, kind: input, shape index: {}]   ;;  %s345_s1 = inlined_call_operand.hbm [shape: f32[16,128], index: 1, kind: input, shape index: {}]   ;;  %s346_s2 = inlined_call_operand.hbm [shape: f32[1,8,128], index: 2, kind: output, shape index: {}]  }
   0x1   :  { %8 = vsyncpa [#allocation6], 0 }
   0x2   :  { %9 = vsyncpa [#allocation4], 0  ;;  %s14_s11 = sshll.u32 %s344_s0, 4  ;;  %s282_s12 = smov [#allocation2]   ;;  %s15_s11 = int_to_ptr.hbm [resolvable:$true] %s14_s11 }
   0x3   :  { %s16_s13 = sshll.u32 %s282_s12, 4  ;;  %s27_s16 = sshll.u32 %s345_s1, 4  ;;  %s17_s13 = int_to_ptr.vmem [resolvable:$true] %s16_s13  ;;  %s28_s16 = int_to_ptr.hbm [resolvable:$true] %s27_s16 }
   0x4   :  { %s283_s17 = smov 128   ;;  %s284_s18 = smov 8  }
   0x5   :  { %22 = dma.hbm_to_vmem [thread:$0]  %s15_s11, 256, %s17_s13, [#allocation3], %s283_s17, %s283_s17, %s284_s18  }
   0x6   :  { %s285_s19 = smov [#allocation5]  }
   0x7   :  { %s29_s20 = sshll.u32 %s285_s19, 4  ;;  %s30_s20 = int_to_ptr.vmem [resolvable:$true] %s29_s20 }
   0x8   :  { %35 = dma.hbm_to_vmem [thread:$0]  %s28_s16, 256, %s30_s20, [#allocation6], %s283_s17, %s283_s17, %s284_s18  }
   0x9   :  { %276 = dma.done.wait [#allocation3], 256  }
   0xa   :  { %277 = vsyncadd [#allocation3], 4294967040 }
   0xb   :  { %278 = dma.done.wait [#allocation6], 256  }
   0xc   :  { %279 = vsyncadd [#allocation6], 4294967040  ;;  %v309_v0 = vld [vmem:[#allocation2] sm:$0xff]  ;;  %v311_v1 = vld [vmem:[#allocation2 + $0x8] sm:$0xff]  ;;  %v286_v9 = vmov 0.0501   ;;  %v48_v33 = vlaneseq }
   0xd   :  { %v63_v2 = vand.u32 2147483647, %v309_v0  ;;  %v64_v3 = vand.u32 2147483647, %v311_v1  ;;  %vm129_vm8 = vcmp.ge.f32.partialorder %v309_v0, 0.0  ;;  %vm130_vm9 = vcmp.ge.f32.partialorder %v311_v1, 0.0 }
   0xe   :  { %v46_v37 = vld [vmem:[#allocation5] sm:$0xff]  ;;  %v47_v41 = vld [vmem:[#allocation5 + $0x8] sm:$0xff]  ;;  %v49_v46 = vshrl.u32 %v48_v33, 7  ;;  %v71_v61 = vmax.f32 %v309_v0, 0.0  ;;  %v72_v62 = vmax.f32 %v311_v1, 0.0  ;;  %s287_s0 = smov [#allocation7]  }
   0xf   :  { %v65_v4 = vsub.f32 0.0, %v63_v2  ;;  %v66_v5 = vsub.f32 0.0, %v64_v3  ;;  %v73_v63 = vmul.f32 %v46_v37, %v309_v0  ;;  %v74_v3 = vmul.f32 %v47_v41, %v311_v1  ;;  %s165_s1 = sshll.u32 %s287_s0, 4  ;;  %s167_s23 = sshll.u32 %s346_s2, 4  ;;  %s166_s1 = int_to_ptr.vmem [resolvable:$true] %s165_s1  ;;  %s168_s23 = int_to_ptr.hbm [resolvable:$true] %s167_s23 }
  0x10   :  { %v50_v58 = vadd.s32 8, %v49_v46 }
  0x11   :  { %v67_v6 = vmul.f32 1.442695, %v65_v4  ;;  %v69_v7 = vmul.f32 1.442695, %v66_v5  ;;  %v76_v1 = vsub.f32 %v72_v62, %v74_v3 }
  0x12   :  { %v58_v0 = vmul.u32 128, %v50_v58 }
  0x13   :  { %186 = vpow2.f32 %v67_v6 }
  0x14   :  { %188 = vpow2.f32 %v69_v7 }
  0x15   :  { %190 = vrcp.f32 %v286_v9 }
  0x19   :  { %v315_v8 = vpop.eup %186 }
  0x1a   :  { %v317_v10 = vpop.eup %188  ;;  %v77_v11 = vadd.f32 1.0, %v315_v8  ;;  %v80_v42 = vmul.f32 -0.5, %v315_v8  ;;  %v83_v54 = vand.u32 2147483647, %v315_v8 }
  0x1b   :  { %v86_v12 = vadd.f32 1.0, %v317_v10  ;;  %v191_v13 = vpop.eup %190  ;;  %v89_v44 = vmul.f32 -0.5, %v317_v10  ;;  %v92_v59 = vand.u32 2147483647, %v317_v10 }
  0x1c   :  { %192 = vrcp.f32 %v77_v11  ;;  %v140_v14 = vmul.f32 0.0501, %v191_v13  ;;  %vm104_vm0 = vweird.f32 %v77_v11  ;;  %v110_v18 = vand.u32 2147483648, %v77_v11 }
  0x1d   :  { %194 = vrcp.f32 %v86_v12  ;;  %v108_v22 = vand.u32 2147483647, %v77_v11  ;;  %v125_v23 = vand.u32 2147483648, %v86_v12  ;;  %vm119_vm2 = vweird.f32 %v86_v12 }
  0x1e   :  { %v141_v20 = vsub.f32 1.0, %v140_v14  ;;  %v123_v25 = vand.u32 2147483647, %v86_v12  ;;  %v111_v27 = vor.u32 1.1754944e-38, %v110_v18  ;;  %196 = vlog2.f32 %v77_v11 }
  0x1f   :  { %vm109_vm5 = vcmp.eq.f32.partialorder %v108_v22, 8.507059e+37  ;;  %v126_v30 = vor.u32 1.1754944e-38, %v125_v23  ;;  %198 = vlog2.f32 %v86_v12  ;;  %vm144_vm10 = vweird.f32 %v191_v13 }
  0x20   :  { %v142_v31 = vmul.f32 %v191_v13, %v141_v20  ;;  %vm124_vm7 = vcmp.eq.f32.partialorder %v123_v25, 8.507059e+37  ;;  %v81_v51 = vadd.f32 1.0, %v80_v42  ;;  %v90_v55 = vadd.f32 1.0, %v89_v44 }
  0x21   :  { %vm334_vm11 = vcmp.lt.f32.partialorder %v83_v54, 0.0004427343  ;;  %v57_v14 = vmul.u32 128, %v49_v46  ;;  %vm93_vm12 = vcmp.lt.f32.partialorder %v92_v59, 0.0004427343 }
  0x22   :  { %v193_v15 = vpop.eup %192  ;;  %v143_v40 = vadd.f32 %v191_v13, %v142_v31  ;;  %v82_v5 = vmul.f32 %v315_v8, %v81_v51 }
  0x23   :  { %v195_v16 = vpop.eup %194  ;;  %v100_v17 = vmul.f32 %v193_v15, %v77_v11  ;;  %vm105_vm1 = vweird.f32 %v193_v15  ;;  %v91_v11 = vmul.f32 %v317_v10, %v90_v55 }
  0x24   :  { %v115_v19 = vmul.f32 %v195_v16, %v86_v12  ;;  %vm120_vm3 = vweird.f32 %v195_v16  ;;  %vm106_vm4 = vmor %vm104_vm0, %vm105_vm1  ;;  %v145_v50 = vsel %vm144_vm10, %v191_v13, %v143_v40  ;;  %v197_v53 = vpop.eup %196  ;;  %v52_v13 = vand.u32 127, %v48_v33 }
  0x25   :  { %v101_v21 = vsub.f32 1.0, %v100_v17  ;;  %vm121_vm6 = vmor %vm119_vm2, %vm120_vm3  ;;  %v199_v57 = vpop.eup %198  ;;  %v79_v4 = vmul.f32 0.6931472, %v197_v53 }
  0x26   :  { %v116_v24 = vsub.f32 1.0, %v115_v19  ;;  %v88_v9 = vmul.f32 0.6931472, %v199_v57  ;;  %v59_v17 = vadd.s32 %v57_v14, %v52_v13  ;;  %v60_v18 = vadd.s32 %v58_v0, %v52_v13 }
  0x27   :  { %v102_v26 = vmul.f32 %v193_v15, %v101_v21 }
  0x28   :  { %v117_v28 = vmul.f32 %v195_v16, %v116_v24  ;;  %vm61_vm13 = vcmp.lt.s32.totalorder %v59_v17, 2048  ;;  %vm62_vm14 = vcmp.lt.s32.totalorder %v60_v18, 2048 }
  0x29   :  { %v103_v29 = vadd.f32 %v193_v15, %v102_v26 }
  0x2a   :  { %v118_v32 = vadd.f32 %v195_v16, %v117_v28 }
  0x2b   :  { %v107_v34 = vsel %vm106_vm4, %v193_v15, %v103_v29  ;;  %v75_v15 = vsub.f32 %v71_v61, %v73_v63 }
  0x2c   :  { %v112_v35 = vsel %vm109_vm5, %v111_v27, %v107_v34  ;;  %v122_v36 = vsel %vm121_vm6, %v195_v16, %v118_v32  ;;  %v94_v16 = vsel %vm93_vm12, %v91_v11, %v88_v9 }
  0x2d   :  { %v127_v38 = vsel %vm124_vm7, %v126_v30, %v122_v36  ;;  %v131_v39 = vmul.f32 %v315_v8, %v112_v35  ;;  %v85_v8 = vsel %vm334_vm11, %v82_v5, %v79_v4  ;;  %v96_v21 = vadd.f32 %v94_v16, %v76_v1 }
  0x2e   :  { %v132_v43 = vmul.f32 %v317_v10, %v127_v38  ;;  %v95_v19 = vadd.f32 %v85_v8, %v75_v15 }
  0x2f   :  { %v133_v45 = vsel %vm129_vm8, %v112_v35, %v131_v39 }
  0x30   :  { %v134_v47 = vsel %vm130_vm9, %v127_v38, %v132_v43  ;;  %v135_v48 = vsub.f32 %v133_v45, %v46_v37 }
  0x31   :  { %v136_v49 = vsub.f32 %v134_v47, %v47_v41 }
  0x32   :  { %v178_v52 = vadd.f32 -1.0, %v135_v48 }
  0x33   :  { %v179_v56 = vadd.f32 -1.0, %v136_v49 }
  0x34   :  { %v146_v60 = vmul.f32 %v178_v52, %v145_v50 }
  0x35   :  { %v147_v2 = vmul.f32 %v179_v56, %v145_v50 }
  0x36   :  { %v148_v6 = vmul.f32 1.442695, %v146_v60 }
  0x37   :  { %v150_v12 = vmul.f32 1.442695, %v147_v2 }
  0x38   :  { %200 = vpow2.f32 %v148_v6 }
  0x39   :  { %202 = vpow2.f32 %v150_v12 }
  0x3e   :  { %v201_v20 = vpop.eup %200 }
  0x3f   :  { %v203_v22 = vpop.eup %202  ;;  %v152_v10 = vsub.f32 1.0, %v201_v20 }
  0x40   :  { %v153_v23 = vsub.f32 1.0, %v203_v22 }
  0x41   :  { %v154_v24 = vmul.f32 %v152_v10, %v95_v19 }
  0x42   :  { %v155_v25 = vmul.f32 %v153_v23, %v96_v21 }
  0x43   :  { %v156_v26 = vsel %vm61_vm13, %v154_v24, 0.0 }
  0x44   :  { %v157_v27 = vsel %vm62_vm14, %v155_v25, 0.0 }
  0x45   :  { %v158_v28 = vadd.f32 %v157_v27, %v156_v26 }
  0x47   :  { %159 = vst [vmem:[#allocation7] sm:$0xff] %v158_v28 }
  0x48   :  { %170 = dma.vmem_to_hbm [thread:$0]  %s166_s1, 128, %s168_s23, [#allocation4]  }
  0x49   :  { %280 = dma.done.wait [#allocation4], 128  }
  0x4a   :  { %281 = vsyncadd [#allocation4], 4294967168 }
  0x4b   :  { %175 = vsyncpa [#allocation3], 1 }
  0x4c   :  { %176 = vsyncpa [#allocation6], 1 }
  0x4d   :  { %177 = vsyncpa [#allocation4], 1 }

</bundles_post_ra>
